<compile_context>
chip_gen: v5e
topology: v5e:2x2
jax: 0.10.0
libtpu: 0.0.40
codegen_flags: <defaults>
</compile_context>

<pallas_src>
import functools

import jax
import jax.numpy as jnp
from jax.experimental import pallas as pl
from jax.experimental.pallas import tpu as pltpu


def _round_up(x, m):
    return (x + m - 1) // m * m


_VMEM = pl.BlockSpec(memory_space=pltpu.MemorySpace.VMEM)


# ----------------------------------------------------------------------------
# Fused kernel: all GCN layers + (batched) MLP/softmax head in one pass.
# ----------------------------------------------------------------------------
def make_fused_gcn_kernel(window):
    def kernel(a_ref, x_ref, gw_ref, gb_ref, w1_ref, b1_ref, w2_ref, b2_ref, o_ref):
        a = a_ref[...]            # [Np, Np]  bf16   normalized adjacency
        x = x_ref[...]            # [Np, D]   bf16   node features (padded)
        w1 = w1_ref[...]          # [D, P]    bf16
        b1 = b1_ref[...]          # [1, P]    f32
        w2 = w2_ref[...]          # [P, T]    bf16
        b2 = b2_ref[...]          # [1, T]    f32   (padded target lanes hold -1e30)

        # ---- GCNConv stack (static unroll; window is small) --------------------
        acts = []
        for i in range(window):
            w = gw_ref[i]                                     # [D, D] bf16
            b = gb_ref[i]                                     # [1, D] f32
            # relu(A_hat @ X @ W + b), f32 accumulation on the MXU.
            ax = jnp.dot(a, x, preferred_element_type=jnp.float32)
            h = jnp.dot(ax.astype(jnp.bfloat16), w,
                        preferred_element_type=jnp.float32)
            h = jnp.maximum(h + b, 0.0)                       # f32 epilogue
            x = h.astype(jnp.bfloat16)                        # next layer's bf16 input
            acts.append(x)

        # ---- MLP head, batched over all layers at once --------------------------
        # [window*Np, D]: one big-M matmul instead of `window` tiny ones.
        xs = jnp.concatenate(acts, axis=0)
        z = jnp.dot(xs, w1, preferred_element_type=jnp.float32)
        z = jnp.maximum(z + b1, 0.0)
        logits = jnp.dot(z.astype(jnp.bfloat16), w2,
                         preferred_element_type=jnp.float32) + b2
        # padded target lanes already carry -1e30 via b2 -> exp underflows to 0.

        # softmax over the (lane-dense) target axis, exact per-row normalization
        m = jnp.max(logits, axis=-1, keepdims=True)
        e = jnp.exp(logits - m)
        denom = jnp.sum(e, axis=-1, keepdims=True)
        o_ref[...] = e * (1.0 / denom)                        # [window*Np, T] f32

    return kernel


def _vmem_budget_bytes(n_pad, d_pad, p_pad, t_pad, window):
    bf16, f32 = 2, 4
    ins = (n_pad * n_pad * bf16            # A_hat
           + n_pad * d_pad * bf16          # X
           + window * d_pad * d_pad * bf16  # stacked GCN weights
           + window * d_pad * f32          # stacked GCN biases
           + d_pad * p_pad * bf16 + p_pad * f32   # fc1
           + p_pad * t_pad * bf16 + t_pad * f32)  # fc2
    out = window * n_pad * t_pad * f32
    # live f32/bf16 temporaries: per-layer ax/h + stacked xs/z/logits/e
    temps = (2 * n_pad * d_pad * f32
             + window * n_pad * d_pad * bf16
             + 3 * window * n_pad * max(d_pad, p_pad, t_pad) * f32)
    budget = int((ins + out + temps) * 1.25) + (1 << 20)      # ~25% headroom
    return min(max(budget, 32 << 20), 128 << 20)


def fused_gcn_call(a_p, x_p, gw, gb, w1, b1, w2, b2, window):
    n_pad = a_p.shape[0]
    d_pad = x_p.shape[1]
    p_pad = w1.shape[1]
    t_pad = w2.shape[1]
    return pl.pallas_call(
        make_fused_gcn_kernel(window),
        out_shape=jax.ShapeDtypeStruct((window * n_pad, t_pad), jnp.float32),
        in_specs=[_VMEM] * 8,
        out_specs=_VMEM,
        compiler_params=pltpu.CompilerParams(
            vmem_limit_bytes=_vmem_budget_bytes(n_pad, d_pad, p_pad, t_pad, window)),
    )(a_p, x_p, gw, gb, w1, b1, w2, b2)


# ----------------------------------------------------------------------------
# Glue: normalized adjacency (PyG gcn_norm, dense), parameter init, forward.
# ----------------------------------------------------------------------------
def build_a_hat(edge_index, num_nodes):
    src = edge_index[0]
    dst = edge_index[1]
    loops = jnp.arange(num_nodes, dtype=edge_index.dtype)
    src = jnp.concatenate([src, loops])
    dst = jnp.concatenate([dst, loops])
    a = jnp.zeros((num_nodes, num_nodes), jnp.float32).at[dst, src].add(1.0)
    deg = jnp.sum(a, axis=1)
    dis = jnp.where(deg > 0, 1.0 / jnp.sqrt(deg), 0.0)
    return dis[:, None] * a * dis[None, :]


def init_params(key, input_dim, hidden_dim, penultimate_dim, n_targets, window):
    params = {}
    dims = [input_dim] + [hidden_dim] * window
    keys = jax.random.split(key, 2 * window + 4)
    gcn_w, gcn_b = [], []
    for i in range(window):
        fan_in, fan_out = dims[i], dims[i + 1]
        lim = jnp.sqrt(6.0 / (fan_in + fan_out))           # glorot
        gcn_w.append(jax.random.uniform(keys[2 * i], (fan_in, fan_out),
                                        jnp.float32, -lim, lim))
        gcn_b.append(jnp.zeros((fan_out,), jnp.float32))
    params["gcn_w"] = gcn_w
    params["gcn_b"] = gcn_b
    k1, k2, k3, k4 = keys[-4:]
    lim1 = 1.0 / jnp.sqrt(hidden_dim)
    params["fc1_w"] = jax.random.uniform(k1, (hidden_dim, penultimate_dim),
                                         jnp.float32, -lim1, lim1)
    params["fc1_b"] = jax.random.uniform(k2, (penultimate_dim,),
                                         jnp.float32, -lim1, lim1)
    lim2 = 1.0 / jnp.sqrt(penultimate_dim)
    params["fc2_w"] = jax.random.uniform(k3, (penultimate_dim, n_targets),
                                         jnp.float32, -lim2, lim2)
    params["fc2_b"] = jax.random.uniform(k4, (n_targets,),
                                         jnp.float32, -lim2, lim2)
    return params


def prepare_static(params, a_hat, num_nodes, input_dim):
    """One-time pad/cast/stack of A_hat and all weights (hoisted out of forward)."""
    window = len(params["gcn_w"])
    hidden = params["gcn_w"][0].shape[1]
    penult = params["fc1_w"].shape[1]
    n_targets = params["fc2_w"].shape[1]

    d_pad = max(_round_up(input_dim, 128), _round_up(hidden, 128))
    p_pad = _round_up(penult, 128)
    t_pad = _round_up(n_targets, 128)
    n_pad = _round_up(num_nodes, 16)                      # bf16 sublane pack

    a_p = jnp.pad(a_hat, ((0, n_pad - num_nodes), (0, n_pad - num_nodes))
                  ).astype(jnp.bfloat16)
    gw = jnp.stack([
        jnp.pad(w, ((0, d_pad - w.shape[0]), (0, d_pad - w.shape[1])))
        for w in params["gcn_w"]
    ]).astype(jnp.bfloat16)                               # [W, D, D]
    gb = jnp.stack([
        jnp.pad(b, (0, d_pad - b.shape[0])) for b in params["gcn_b"]
    ])[:, None, :].astype(jnp.float32)                    # [W, 1, D]
    w1 = jnp.pad(params["fc1_w"], ((0, d_pad - hidden), (0, p_pad - penult))
                 ).astype(jnp.bfloat16)
    b1 = jnp.pad(params["fc1_b"], (0, p_pad - penult))[None, :].astype(jnp.float32)
    w2 = jnp.pad(params["fc2_w"], ((0, p_pad - penult), (0, t_pad - n_targets))
                 ).astype(jnp.bfloat16)
    # Bake the target-lane mask into the bias: padded lanes get -1e30 so the in-kernel
    # softmax needs no iota/compare/select.
    b2 = jnp.pad(params["fc2_b"], (0, t_pad - n_targets),
                 constant_values=-1e30)[None, :].astype(jnp.float32)

    meta = dict(window=window, n=num_nodes, n_pad=n_pad, f_in=input_dim,
                d_pad=d_pad, n_targets=n_targets)
    static = dict(a_p=a_p, gw=gw, gb=gb, w1=w1, b1=b1, w2=w2, b2=b2)
    return static, meta


@functools.partial(jax.jit,
                   static_argnames=("window", "n", "n_pad", "f_in", "d_pad",
                                    "n_targets"))
def gcn_forward(x_features, a_p, gw, gb, w1, b1, w2, b2, *,
                window, n, n_pad, f_in, d_pad, n_targets):
    # Only the (tiny) node-feature matrix is padded per call.
    x_p = jnp.pad(x_features, ((0, n_pad - n), (0, d_pad - f_in))).astype(jnp.bfloat16)

    out = fused_gcn_call(a_p, x_p, gw, gb, w1, b1, w2, b2, window)

    t_pad = w2.shape[1]
    probs = out.reshape(window, n_pad, t_pad)[:, :n, :n_targets]   # [W, N, T]
    chunk = -(-n_targets // 3)                                     # torch.chunk(3, -1)
    return (probs[..., 0 * chunk:1 * chunk],
            probs[..., 1 * chunk:2 * chunk],
            probs[..., 2 * chunk:])


def reference_forward(params, x_features, a_hat, window, n_targets):
    # Pure-JAX f32 reference mirroring the torch module (eval mode).
    x = x_features
    lst = []
    for i in range(window):
        x = jnp.maximum(a_hat @ (x @ params["gcn_w"][i]) + params["gcn_b"][i], 0.0)
        lst.append(x[:, None, :])
    stacked = jnp.concatenate(lst, axis=1)                    # [N, W, H]
    h = jnp.maximum(stacked @ params["fc1_w"] + params["fc1_b"], 0.0)
    logits = h @ params["fc2_w"] + params["fc2_b"]            # [N, W, T]
    logits = jnp.transpose(logits, (1, 0, 2))                 # [W, N, T]
    probs = jax.nn.softmax(logits, axis=2)
    chunk = -(-n_targets // 3)
    return (probs[..., 0 * chunk:1 * chunk],
            probs[..., 1 * chunk:2 * chunk],
            probs[..., 2 * chunk:])


# ----------------------------------------------------------------------------
if __name__ == "__main__":
    N_NODES = 16
    INPUT_DIM = 8
    HIDDEN_DIM = 32
    PENULTIMATE_DIM = 16
    N_TARGETS = 3          # S, I, R
    WINDOW = 3
    # dropout rate irrelevant (eval mode / identity)

    key = jax.random.PRNGKey(0)
    k_x, k_p = jax.random.split(key)

    x_features = jax.random.normal(k_x, (N_NODES, INPUT_DIM), jnp.float32)

    # Deterministic ring graph (both directions) as edge_index [2, E].
    src = jnp.arange(N_NODES, dtype=jnp.int32)
    dst = (src + 1) % N_NODES
    edge_index = jnp.stack([jnp.concatenate([src, dst]),
                            jnp.concatenate([dst, src])], axis=0)

    a_hat = build_a_hat(edge_index, N_NODES)
    params = init_params(k_p, INPUT_DIM, HIDDEN_DIM, PENULTIMATE_DIM,
                         N_TARGETS, WINDOW)

    # One-time prep (pad/cast A_hat + weights) hoisted out of the per-call path.
    static, meta = prepare_static(params, a_hat, N_NODES, INPUT_DIM)

    S, I, R = gcn_forward(x_features, static["a_p"], static["gw"], static["gb"],
                          static["w1"], static["b1"], static["w2"], static["b2"],
                          **meta)
    jax.block_until_ready((S, I, R))

    assert S.shape == (WINDOW, N_NODES, 1)
    assert I.shape == (WINDOW, N_NODES, 1)
    assert R.shape == (WINDOW, N_NODES, 1)

    # rows of softmax must sum to 1 (exact per-row reciprocal -> tight)
    total = S[..., 0] + I[..., 0] + R[..., 0]
    assert jnp.allclose(total, 1.0, atol=1e-3), "softmax rows do not sum to 1"

    # compare against pure-JAX f32 reference (bf16 MXU inputs -> loose tolerance)
    S_ref, I_ref, R_ref = reference_forward(params, x_features, a_hat,
                                            WINDOW, N_TARGETS)
    assert jnp.allclose(S, S_ref, atol=3e-2), "S mismatch vs reference"
    assert jnp.allclose(I, I_ref, atol=3e-2), "I mismatch vs reference"
    assert jnp.allclose(R, R_ref, atol=3e-2), "R mismatch vs reference"

    print("KERNEL_OK")
</pallas_src>

<mosaic_0001>
module attributes {stable_mosaic.version = 11 : i64} {
  func.func @kernel(%arg0: memref<16x16xbf16, #tpu.memory_space<vmem>>, %arg1: memref<16x128xbf16, #tpu.memory_space<vmem>>, %arg2: memref<3x128x128xbf16, #tpu.memory_space<vmem>>, %arg3: memref<3x1x128xf32, #tpu.memory_space<vmem>>, %arg4: memref<128x128xbf16, #tpu.memory_space<vmem>>, %arg5: memref<1x128xf32, #tpu.memory_space<vmem>>, %arg6: memref<128x128xbf16, #tpu.memory_space<vmem>>, %arg7: memref<1x128xf32, #tpu.memory_space<vmem>>, %arg8: memref<48x128xf32, #tpu.memory_space<vmem>>) attributes {dimension_semantics = [], scalar_prefetch = 0 : i64, scratch_operands = 0 : i64, tpu.core_type = #tpu.core_type<tc>} {
    %c0 = arith.constant 0 : index
    %c0_0 = arith.constant 0 : index
    %0 = vector.load %arg0[%c0, %c0_0] : memref<16x16xbf16, #tpu.memory_space<vmem>>, vector<16x16xbf16>
    %c0_1 = arith.constant 0 : index
    %c0_2 = arith.constant 0 : index
    %1 = vector.load %arg1[%c0_1, %c0_2] : memref<16x128xbf16, #tpu.memory_space<vmem>>, vector<16x128xbf16>
    %c0_3 = arith.constant 0 : index
    %c0_4 = arith.constant 0 : index
    %2 = vector.load %arg4[%c0_3, %c0_4] : memref<128x128xbf16, #tpu.memory_space<vmem>>, vector<128x128xbf16>
    %c0_5 = arith.constant 0 : index
    %c0_6 = arith.constant 0 : index
    %3 = vector.load %arg5[%c0_5, %c0_6] : memref<1x128xf32, #tpu.memory_space<vmem>>, vector<1x128xf32>
    %c0_7 = arith.constant 0 : index
    %c0_8 = arith.constant 0 : index
    %4 = vector.load %arg6[%c0_7, %c0_8] : memref<128x128xbf16, #tpu.memory_space<vmem>>, vector<128x128xbf16>
    %c0_9 = arith.constant 0 : index
    %c0_10 = arith.constant 0 : index
    %5 = vector.load %arg7[%c0_9, %c0_10] : memref<1x128xf32, #tpu.memory_space<vmem>>, vector<1x128xf32>
    %c0_11 = arith.constant 0 : index
    %c0_12 = arith.constant 0 : index
    %c0_13 = arith.constant 0 : index
    %6 = vector.load %arg2[%c0_11, %c0_12, %c0_13] : memref<3x128x128xbf16, #tpu.memory_space<vmem>>, vector<1x128x128xbf16>
    %7 = vector.shape_cast %6 : vector<1x128x128xbf16> to vector<128x128xbf16>
    %c0_14 = arith.constant 0 : index
    %c0_15 = arith.constant 0 : index
    %c0_16 = arith.constant 0 : index
    %8 = vector.load %arg3[%c0_14, %c0_15, %c0_16] : memref<3x1x128xf32, #tpu.memory_space<vmem>>, vector<1x1x128xf32>
    %9 = vector.shape_cast %8 : vector<1x1x128xf32> to vector<1x128xf32>
    %cst = arith.constant dense<0.000000e+00> : vector<16x128xf32>
    %10 = tpu.matmul %0, %1, %cst {dimension_numbers = #tpu.dot_dimension_numbers<[1], [0], [0], [1], [0, 0, 1, 1], [], []>} : vector<16x16xbf16>, vector<16x128xbf16>, vector<16x128xf32> -> vector<16x128xf32>
    %11 = arith.truncf %10 : vector<16x128xf32> to vector<16x128xbf16>
    %cst_17 = arith.constant dense<0.000000e+00> : vector<16x128xf32>
    %12 = tpu.matmul %11, %7, %cst_17 {dimension_numbers = #tpu.dot_dimension_numbers<[1], [0], [0], [1], [0, 0, 1, 1], [], []>} : vector<16x128xbf16>, vector<128x128xbf16>, vector<16x128xf32> -> vector<16x128xf32>
    %13 = vector.broadcast %9 : vector<1x128xf32> to vector<16x128xf32>
    %14 = arith.addf %12, %13 : vector<16x128xf32>
    %cst_18 = arith.constant 0.000000e+00 : f32
    %15 = vector.broadcast %cst_18 : f32 to vector<16x128xf32>
    %16 = arith.maximumf %14, %15 : vector<16x128xf32>
    %17 = arith.truncf %16 : vector<16x128xf32> to vector<16x128xbf16>
    %c1 = arith.constant 1 : index
    %c0_19 = arith.constant 0 : index
    %c0_20 = arith.constant 0 : index
    %18 = vector.load %arg2[%c1, %c0_19, %c0_20] : memref<3x128x128xbf16, #tpu.memory_space<vmem>>, vector<1x128x128xbf16>
    %19 = vector.shape_cast %18 : vector<1x128x128xbf16> to vector<128x128xbf16>
    %c1_21 = arith.constant 1 : index
    %c0_22 = arith.constant 0 : index
    %c0_23 = arith.constant 0 : index
    %20 = vector.load %arg3[%c1_21, %c0_22, %c0_23] : memref<3x1x128xf32, #tpu.memory_space<vmem>>, vector<1x1x128xf32>
    %21 = vector.shape_cast %20 : vector<1x1x128xf32> to vector<1x128xf32>
    %cst_24 = arith.constant dense<0.000000e+00> : vector<16x128xf32>
    %22 = tpu.matmul %0, %17, %cst_24 {dimension_numbers = #tpu.dot_dimension_numbers<[1], [0], [0], [1], [0, 0, 1, 1], [], []>} : vector<16x16xbf16>, vector<16x128xbf16>, vector<16x128xf32> -> vector<16x128xf32>
    %23 = arith.truncf %22 : vector<16x128xf32> to vector<16x128xbf16>
    %cst_25 = arith.constant dense<0.000000e+00> : vector<16x128xf32>
    %24 = tpu.matmul %23, %19, %cst_25 {dimension_numbers = #tpu.dot_dimension_numbers<[1], [0], [0], [1], [0, 0, 1, 1], [], []>} : vector<16x128xbf16>, vector<128x128xbf16>, vector<16x128xf32> -> vector<16x128xf32>
    %25 = vector.broadcast %21 : vector<1x128xf32> to vector<16x128xf32>
    %26 = arith.addf %24, %25 : vector<16x128xf32>
    %cst_26 = arith.constant 0.000000e+00 : f32
    %27 = vector.broadcast %cst_26 : f32 to vector<16x128xf32>
    %28 = arith.maximumf %26, %27 : vector<16x128xf32>
    %29 = arith.truncf %28 : vector<16x128xf32> to vector<16x128xbf16>
    %c2 = arith.constant 2 : index
    %c0_27 = arith.constant 0 : index
    %c0_28 = arith.constant 0 : index
    %30 = vector.load %arg2[%c2, %c0_27, %c0_28] : memref<3x128x128xbf16, #tpu.memory_space<vmem>>, vector<1x128x128xbf16>
    %31 = vector.shape_cast %30 : vector<1x128x128xbf16> to vector<128x128xbf16>
    %c2_29 = arith.constant 2 : index
    %c0_30 = arith.constant 0 : index
    %c0_31 = arith.constant 0 : index
    %32 = vector.load %arg3[%c2_29, %c0_30, %c0_31] : memref<3x1x128xf32, #tpu.memory_space<vmem>>, vector<1x1x128xf32>
    %33 = vector.shape_cast %32 : vector<1x1x128xf32> to vector<1x128xf32>
    %cst_32 = arith.constant dense<0.000000e+00> : vector<16x128xf32>
    %34 = tpu.matmul %0, %29, %cst_32 {dimension_numbers = #tpu.dot_dimension_numbers<[1], [0], [0], [1], [0, 0, 1, 1], [], []>} : vector<16x16xbf16>, vector<16x128xbf16>, vector<16x128xf32> -> vector<16x128xf32>
    %35 = arith.truncf %34 : vector<16x128xf32> to vector<16x128xbf16>
    %cst_33 = arith.constant dense<0.000000e+00> : vector<16x128xf32>
    %36 = tpu.matmul %35, %31, %cst_33 {dimension_numbers = #tpu.dot_dimension_numbers<[1], [0], [0], [1], [0, 0, 1, 1], [], []>} : vector<16x128xbf16>, vector<128x128xbf16>, vector<16x128xf32> -> vector<16x128xf32>
    %37 = vector.broadcast %33 : vector<1x128xf32> to vector<16x128xf32>
    %38 = arith.addf %36, %37 : vector<16x128xf32>
    %cst_34 = arith.constant 0.000000e+00 : f32
    %39 = vector.broadcast %cst_34 : f32 to vector<16x128xf32>
    %40 = arith.maximumf %38, %39 : vector<16x128xf32>
    %41 = arith.truncf %40 : vector<16x128xf32> to vector<16x128xbf16>
    %42 = tpu.concatenate %17, %29, %41 in 0 : vector<16x128xbf16>, vector<16x128xbf16>, vector<16x128xbf16> -> vector<48x128xbf16>
    %cst_35 = arith.constant dense<0.000000e+00> : vector<48x128xf32>
    %43 = tpu.matmul %42, %2, %cst_35 {dimension_numbers = #tpu.dot_dimension_numbers<[1], [0], [0], [1], [0, 0, 1, 1], [], []>} : vector<48x128xbf16>, vector<128x128xbf16>, vector<48x128xf32> -> vector<48x128xf32>
    %44 = vector.broadcast %3 : vector<1x128xf32> to vector<48x128xf32>
    %45 = arith.addf %43, %44 : vector<48x128xf32>
    %cst_36 = arith.constant 0.000000e+00 : f32
    %46 = vector.broadcast %cst_36 : f32 to vector<48x128xf32>
    %47 = arith.maximumf %45, %46 : vector<48x128xf32>
    %48 = arith.truncf %47 : vector<48x128xf32> to vector<48x128xbf16>
    %cst_37 = arith.constant dense<0.000000e+00> : vector<48x128xf32>
    %49 = tpu.matmul %48, %4, %cst_37 {dimension_numbers = #tpu.dot_dimension_numbers<[1], [0], [0], [1], [0, 0, 1, 1], [], []>} : vector<48x128xbf16>, vector<128x128xbf16>, vector<48x128xf32> -> vector<48x128xf32>
    %50 = vector.broadcast %5 : vector<1x128xf32> to vector<48x128xf32>
    %51 = arith.addf %49, %50 : vector<48x128xf32>
    %cst_38 = arith.constant dense<0xFF800000> : vector<48xf32>
    %52 = vector.multi_reduction <maximumf>, %51, %cst_38 [1] : vector<48x128xf32> to vector<48xf32>
    %53 = vector.shape_cast %52 : vector<48xf32> to vector<48x1xf32>
    %54 = vector.broadcast %53 : vector<48x1xf32> to vector<48x128xf32>
    %55 = arith.subf %51, %54 : vector<48x128xf32>
    %56 = math.exp %55 : vector<48x128xf32>
    %cst_39 = arith.constant dense<0.000000e+00> : vector<48xf32>
    %57 = vector.multi_reduction <add>, %56, %cst_39 [1] : vector<48x128xf32> to vector<48xf32>
    %58 = vector.shape_cast %57 : vector<48xf32> to vector<48x1xf32>
    %cst_40 = arith.constant 1.000000e+00 : f32
    %59 = vector.broadcast %cst_40 : f32 to vector<48x1xf32>
    %60 = arith.divf %59, %58 : vector<48x1xf32>
    %61 = vector.broadcast %60 : vector<48x1xf32> to vector<48x128xf32>
    %62 = arith.mulf %56, %61 : vector<48x128xf32>
    %c0_41 = arith.constant 0 : index
    %c0_42 = arith.constant 0 : index
    %63 = vector.load %arg8[%c0_41, %c0_42] : memref<48x128xf32, #tpu.memory_space<vmem>>, vector<48x128xf32>
    tpu.vector_store %arg8[%c0_41, %c0_42], %62 {strides = array<i32>} : memref<48x128xf32, #tpu.memory_space<vmem>>, vector<48x128xf32>,
    return
  }
}

</mosaic_0001>

<bundles_post_ra>
// kernel: gcn_forward.1
= control target key start
LH: loop header
LB: loop body
LE: loop exit
PB: predicated region body
PF: predicated region fallthrough
CT: control target
= control target key end

     0   :  { %13 = vsyncpa [#allocation3], 0  ;;  %s1207_s0 = inlined_call_operand.vmem [shape: bf16[16,16], index: 0, kind: input, shape index: {}]   ;;  %s1208_s1 = inlined_call_operand.vmem [shape: bf16[16,128], index: 1, kind: input, shape index: {}]   ;;  %s1209_s2 = inlined_call_operand.hbm [shape: bf16[3,128,128], index: 2, kind: input, shape index: {}]   ;;  %s1210_s3 = inlined_call_operand.vmem [shape: f32[3,1,128], index: 3, kind: input, shape index: {}]   ;;  %s1211_s4 = inlined_call_operand.hbm [shape: bf16[128,128], index: 4, kind: input, shape index: {}]   ;;  %s1212_s5 = inlined_call_operand.vmem [shape: f32[1,128], index: 5, kind: input, shape index: {}]   ;;  %s1213_s6 = inlined_call_operand.hbm [shape: bf16[128,128], index: 6, kind: input, shape index: {}]   ;;  %s1214_s7 = inlined_call_operand.vmem [shape: f32[1,128], index: 7, kind: input, shape index: {}]   ;;  %s1215_s8 = inlined_call_operand.vmem [shape: f32[48,128], index: 8, kind: output, shape index: {}]  }
   0x1   :  { %14 = vsyncpa [#allocation5], 0  ;;  %s38_s29 = sshll.u32 %s1211_s4, 4  ;;  %s1089_s30 = smov [#allocation4]   ;;  %s39_s29 = int_to_ptr.hbm [resolvable:$true] %s38_s29 }
   0x2   :  { %s40_s9 = sshll.u32 %s1089_s30, 4  ;;  %s23_s12 = sshll.u32 %s1209_s2, 4  ;;  %s41_s9 = int_to_ptr.vmem [resolvable:$true] %s40_s9  ;;  %s24_s12 = int_to_ptr.hbm [resolvable:$true] %s23_s12 }
   0x3   :  { %s1090_s13 = smov 64   ;;  %s1091_s14 = smov 4  }
   0x4   :  { %46 = dma.hbm_to_vmem [thread:$0]  %s39_s29, 1024, %s41_s9, [#allocation5], %s1090_s13, %s1090_s13, %s1091_s14  }
   0x5   :  { %s1092_s15 = smov [#allocation2]   ;;  %s53_s19 = sshll.u32 %s1213_s6, 4  ;;  %s54_s19 = int_to_ptr.hbm [resolvable:$true] %s53_s19 }
   0x6   :  { %s25_s16 = sshll.u32 %s1092_s15, 4  ;;  %s1093_s4 = smov [#allocation6]   ;;  %s26_s16 = int_to_ptr.vmem [resolvable:$true] %s25_s16 }
   0x7   :  { %31 = dma.hbm_to_vmem [thread:$0]  %s24_s12, 3072, %s26_s16, [#allocation3], %s1090_s13, %s1090_s13, %s1091_s14  }
   0x8   :  { %s55_s20 = sshll.u32 %s1093_s4, 4  ;;  %s56_s20 = int_to_ptr.vmem [resolvable:$true] %s55_s20 }
   0x9   :  { %61 = dma.hbm_to_vmem [thread:$0]  %s54_s19, 1024, %s56_s20, [#allocation5], %s1090_s13, %s1090_s13, %s1091_s14  }
   0xa   :  { %1085 = dma.done.wait [#allocation3], 3072  }
   0xb   :  { %1086 = vsyncadd [#allocation3], 4294964224 }
   0xc   :  { %1087 = dma.done.wait [#allocation5], 2048  }
   0xd   :  { %1088 = vsyncadd [#allocation5], 4294965248  ;;  %v938_v0 = vld [vmem:[%s1208_s1] sm:$0xff]  ;;  %v962_v1 = vld [vmem:[#allocation2 + $0x38] sm:$0xff]  ;;  %vm143_vm0 = vcmask 130048  }
   0xe   :  { %v1154_v2 = vld [vmem:[%s1207_s0] sm:$0xff]  ;;  %154 = vmatpush.bf16.msra.mxu2 %v938_v0  ;;  %213 = vmatpush.bf16.msra.mxu3 %v962_v1  ;;  %v961_v3 = vld [vmem:[#allocation2 + $0x30] sm:$0xff]  ;;  %v960_v4 = vld [vmem:[#allocation2 + $0x28] sm:$0xff] }
   0xf   :  { %v959_v5 = vld [vmem:[#allocation2 + $0x20] sm:$0xff]  ;;  %v958_v6 = vld [vmem:[#allocation2 + $0x18] sm:$0xff]  ;;  %v957_v7 = vld [vmem:[#allocation2 + $0x10] sm:$0xff] }
  0x10   :  { %v956_v8 = vld [vmem:[#allocation2 + $0x8] sm:$0xff]  ;;  %v955_v9 = vld [vmem:[#allocation2] sm:$0xff]  ;;  %v970_v13 = vld [vmem:[#allocation2 + $0x78] sm:$0xff] }
  0x11   :  { %772 = vmatmul.msk.bf16.vlgmr.msra.gmra.mxu2 %vm143_vm0, %v1154_v2  ;;  %v969_v14 = vld [vmem:[#allocation2 + $0x70] sm:$0xff]  ;;  %v968_v15 = vld [vmem:[#allocation2 + $0x68] sm:$0xff]  ;;  %v984_v16 = vld [vmem:[%s1210_s3] ss:$0 sm:$0xff] }
  0x12   :  { %214 = vmatpush.bf16.msra.mxu3 %v961_v3  ;;  %v967_v18 = vld [vmem:[#allocation2 + $0x60] sm:$0xff]  ;;  %v966_v20 = vld [vmem:[#allocation2 + $0x58] sm:$0xff]  ;;  %v965_v30 = vld [vmem:[#allocation2 + $0x50] sm:$0xff] }
  0x13   :  { %v964_v31 = vld [vmem:[#allocation2 + $0x48] sm:$0xff]  ;;  %v963_v32 = vld [vmem:[#allocation2 + $0x40] sm:$0xff]  ;;  %v946_v47 = vld [vmem:[#allocation4 + $0x38] sm:$0xff] }
  0x14   :  { %v985_v36 = vld [vmem:[%s1210_s3 + $0x1] ss:$0 sm:$0xff]  ;;  %v945_v49 = vld [vmem:[#allocation4 + $0x30] sm:$0xff]  ;;  %v944_v50 = vld [vmem:[#allocation4 + $0x28] sm:$0xff] }
  0x15   :  { %v943_v51 = vld [vmem:[#allocation4 + $0x20] sm:$0xff]  ;;  %v942_v52 = vld [vmem:[#allocation4 + $0x18] sm:$0xff]  ;;  %v941_v54 = vld [vmem:[#allocation4 + $0x10] sm:$0xff] }
  0x16   :  { %215 = vmatpush.bf16.msra.mxu3 %v960_v4  ;;  %v978_v53 = vld [vmem:[#allocation2 + $0xb8] sm:$0xff]  ;;  %v977_v55 = vld [vmem:[#allocation2 + $0xb0] sm:$0xff]  ;;  %v940_v56 = vld [vmem:[#allocation4 + $0x8] sm:$0xff] }
  0x17   :  { %v976_v57 = vld [vmem:[#allocation2 + $0xa8] sm:$0xff]  ;;  %v939_v58 = vld [vmem:[#allocation4] sm:$0xff]  ;;  %v974_v60 = vld [vmem:[#allocation2 + $0x98] sm:$0xff] }
  0x18   :  { %v975_v59 = vld [vmem:[#allocation2 + $0xa0] sm:$0xff]  ;;  %v973_v61 = vld [vmem:[#allocation2 + $0x90] sm:$0xff]  ;;  %v972_v62 = vld [vmem:[#allocation2 + $0x88] sm:$0xff] }
  0x19   :  { %v971_v63 = vld [vmem:[#allocation2 + $0x80] sm:$0xff]  ;;  %v954_v0 = vld [vmem:[#allocation6 + $0x38] sm:$0xff]  ;;  %v953_v1 = vld [vmem:[#allocation6 + $0x30] sm:$0xff] }
  0x1a   :  { %216 = vmatpush.bf16.msra.mxu3 %v959_v5  ;;  %590 = vmatpush.bf16.msra.mxu1 %v954_v0  ;;  %v951_v3 = vld [vmem:[#allocation6 + $0x20] sm:$0xff]  ;;  %v950_v4 = vld [vmem:[#allocation6 + $0x18] sm:$0xff]  ;;  %v949_v5 = vld [vmem:[#allocation6 + $0x10] sm:$0xff] }
  0x1e   :  { %217 = vmatpush.bf16.msra.mxu3 %v958_v6  ;;  %591 = vmatpush.bf16.msra.mxu1 %v953_v1 }
  0x22   :  { %218 = vmatpush.bf16.msra.mxu3 %v957_v7  ;;  %v948_v7 = vld [vmem:[#allocation6 + $0x8] sm:$0xff] }
  0x26   :  { %219 = vmatpush.bf16.msra.mxu3 %v956_v8  ;;  %v947_v8 = vld [vmem:[#allocation6] sm:$0xff] }
  0x2a   :  { %220 = vmatpush.bf16.msra.mxu3 %v955_v9 }
  0x2e   :  { %322 = vmatpush.bf16.msrb.mxu3 %v970_v13 }
  0x32   :  { %323 = vmatpush.bf16.msrb.mxu3 %v969_v14 }
  0x36   :  { %324 = vmatpush.bf16.msrb.mxu3 %v968_v15 }
  0x3a   :  { %325 = vmatpush.bf16.msrb.mxu3 %v967_v18 }
  0x3e   :  { %326 = vmatpush.bf16.msrb.mxu3 %v966_v20 }
  0x42   :  { %327 = vmatpush.bf16.msrb.mxu3 %v965_v30 }
  0x46   :  { %328 = vmatpush.bf16.msrb.mxu3 %v964_v31 }
  0x4a   :  { %329 = vmatpush.bf16.msrb.mxu3 %v963_v32 }
  0x94   :  { %v156_v10 = vpop.f32.mrf.mxu2 }
  0x9c   :  { %v158_v11 = vpop.f32.mrf.mxu2 }
  0x9d   :  { %v161_v12 = vpack.c.bf16 %v158_v11, %v156_v10 }
  0x9f   :  { %221 = vmatmul.bf16.vlgmr.msra.gmra.mxu3 %v161_v12  ;;  %v986_v12 = vld [vmem:[%s1212_s5] ss:$0 sm:$0xff] }
 0x122   :  { %v222_v17 = vpop.f32.mrf.mxu3 }
 0x123   :  { %v223_v19 = vadd.f32 %v984_v16, %v222_v17 }
 0x125   :  { %v227_v21 = vmax.f32 %v223_v19, 0.0 }
 0x127   :  { %v229_v24 = vpack.c.bf16 %v227_v21, %v227_v21 }
 0x129   :  { %v252_v27 = vunpack.c.l.b16 %v229_v24 }
 0x12a   :  { %v224_v22 = vpop.f32.mrf.mxu3 }
 0x12b   :  { %v225_v23 = vadd.f32 %v984_v16, %v224_v22 }
 0x12d   :  { %v228_v25 = vmax.f32 %v225_v23, 0.0 }
 0x12f   :  { %v230_v26 = vpack.c.bf16 %v228_v25, %v228_v25 }
 0x131   :  { %v253_v28 = vunpack.c.l.b16 %v230_v26  ;;  %v987_v26 = vld [vmem:[%s1210_s3 + $0x2] ss:$0 sm:$0xff] }
 0x133   :  { %v254_v29 = vpack.c.b16 %v253_v28, %v252_v27 }
 0x135   :  { %263 = vmatpush.bf16.msrb.mxu2 %v254_v29 }
 0x138   :  { %806 = vmatmul.msk.bf16.vlgmr.msrb.gmra.mxu2 %vm143_vm0, %v1154_v2 }
 0x139   :  { %431 = vmatpush.bf16.msra.mxu2 %v978_v53 }
 0x13d   :  { %432 = vmatpush.bf16.msra.mxu2 %v977_v55 }
 0x141   :  { %433 = vmatpush.bf16.msra.mxu2 %v976_v57 }
 0x145   :  { %434 = vmatpush.bf16.msra.mxu2 %v975_v59 }
 0x149   :  { %435 = vmatpush.bf16.msra.mxu2 %v974_v60 }
 0x14d   :  { %436 = vmatpush.bf16.msra.mxu2 %v973_v61 }
 0x151   :  { %437 = vmatpush.bf16.msra.mxu2 %v972_v62 }
 0x155   :  { %438 = vmatpush.bf16.msra.mxu2 %v971_v63 }
 0x1bb   :  { %v265_v33 = vpop.f32.mrf.mxu2 }
 0x1c3   :  { %v267_v34 = vpop.f32.mrf.mxu2 }
 0x1c4   :  { %v270_v35 = vpack.c.bf16 %v267_v34, %v265_v33 }
 0x1c6   :  { %330 = vmatmul.bf16.vlgmr.msrb.gmra.mxu3 %v270_v35 }
 0x249   :  { %v331_v37 = vpop.f32.mrf.mxu3 }
 0x24a   :  { %v332_v38 = vadd.f32 %v985_v36, %v331_v37 }
 0x24c   :  { %v336_v39 = vmax.f32 %v332_v38, 0.0  ;;  %v1177_v38 = vld [vmem:[%s1214_s7] ss:$0 sm:$0xff] }
 0x24e   :  { %v338_v42 = vpack.c.bf16 %v336_v39, %v336_v39 }
 0x250   :  { %v361_v45 = vunpack.c.l.b16 %v338_v42 }
 0x251   :  { %v333_v40 = vpop.f32.mrf.mxu3 }
 0x252   :  { %v334_v41 = vadd.f32 %v985_v36, %v333_v40 }
 0x254   :  { %v337_v43 = vmax.f32 %v334_v41, 0.0 }
 0x256   :  { %v339_v44 = vpack.c.bf16 %v337_v43, %v337_v43 }
 0x258   :  { %v362_v46 = vunpack.c.l.b16 %v339_v44 }
 0x25a   :  { %v363_v48 = vpack.c.b16 %v362_v46, %v361_v45 }
 0x25c   :  { %372 = vmatpush.bf16.msra.mxu0 %v363_v48 }
 0x25f   :  { %840 = vmatmul.msk.bf16.vlgmr.msra.gmra.mxu0 %vm143_vm0, %v1154_v2  ;;  %v952_v2 = vld [vmem:[#allocation6 + $0x28] sm:$0xff] }
 0x260   :  { %506 = vmatpush.bf16.msrb.mxu0 %v946_v47  ;;  %592 = vmatpush.bf16.msra.mxu1 %v952_v2 }
 0x264   :  { %507 = vmatpush.bf16.msrb.mxu0 %v945_v49  ;;  %593 = vmatpush.bf16.msra.mxu1 %v951_v3 }
 0x268   :  { %508 = vmatpush.bf16.msrb.mxu0 %v944_v50  ;;  %594 = vmatpush.bf16.msra.mxu1 %v950_v4 }
 0x26c   :  { %509 = vmatpush.bf16.msrb.mxu0 %v943_v51  ;;  %595 = vmatpush.bf16.msra.mxu1 %v949_v5 }
 0x270   :  { %510 = vmatpush.bf16.msrb.mxu0 %v942_v52  ;;  %596 = vmatpush.bf16.msra.mxu1 %v948_v7 }
 0x274   :  { %511 = vmatpush.bf16.msrb.mxu0 %v941_v54  ;;  %597 = vmatpush.bf16.msra.mxu1 %v947_v8 }
 0x278   :  { %512 = vmatpush.bf16.msrb.mxu0 %v940_v56 }
 0x27c   :  { %513 = vmatpush.bf16.msrb.mxu0 %v939_v58 }
 0x27f   :  { %514 = vmatmul.bf16.vlgmr.msrb.gmra.mxu0 %v254_v29 }
 0x28f   :  { %519 = vmatmul.bf16.gmra.mxu0 %v363_v48 }
 0x2dc   :  { %v374_v6 = vpop.f32.mrf.mxu0 }
 0x2e4   :  { %v376_v9 = vpop.f32.mrf.mxu0 }
 0x2e5   :  { %v379_v10 = vpack.c.bf16 %v376_v9, %v374_v6 }
 0x2e7   :  { %439 = vmatmul.bf16.vlgmr.msra.gmra.mxu2 %v379_v10 }
 0x2fc   :  { %v515_v11 = vpop.f32.mrf.mxu0 }
 0x2fd   :  { %v516_v13 = vadd.f32 %v986_v12, %v515_v11 }
 0x2ff   :  { %v530_v16 = vmax.f32 %v516_v13, 0.0 }
 0x304   :  { %v517_v14 = vpop.f32.mrf.mxu0 }
 0x305   :  { %v518_v15 = vadd.f32 %v986_v12, %v517_v14 }
 0x307   :  { %v531_v17 = vmax.f32 %v518_v15, 0.0 }
 0x309   :  { %v536_v18 = vpack.c.bf16 %v531_v17, %v530_v16 }
 0x30b   :  { %598 = vmatmul.bf16.vlgmr.msra.gmra.mxu1 %v536_v18 }
 0x30c   :  { %v520_v19 = vpop.f32.mrf.mxu0 }
 0x30d   :  { %v521_v20 = vadd.f32 %v986_v12, %v520_v19 }
 0x30f   :  { %v532_v23 = vmax.f32 %v521_v20, 0.0 }
 0x314   :  { %v522_v21 = vpop.f32.mrf.mxu0 }
 0x315   :  { %v523_v22 = vadd.f32 %v986_v12, %v522_v21 }
 0x317   :  { %v533_v24 = vmax.f32 %v523_v22, 0.0 }
 0x319   :  { %v537_v25 = vpack.c.bf16 %v533_v24, %v532_v23 }
 0x31b   :  { %603 = vmatmul.bf16.gmra.mxu1 %v537_v25 }
 0x36a   :  { %v440_v27 = vpop.f32.mrf.mxu2 }
 0x36b   :  { %v441_v28 = vadd.f32 %v987_v26, %v440_v27 }
 0x36d   :  { %v445_v29 = vmax.f32 %v441_v28, 0.0 }
 0x36f   :  { %v447_v32 = vpack.c.bf16 %v445_v29, %v445_v29 }
 0x371   :  { %v451_v35 = vunpack.c.l.b16 %v447_v32 }
 0x372   :  { %v442_v30 = vpop.f32.mrf.mxu2 }
 0x373   :  { %v443_v31 = vadd.f32 %v987_v26, %v442_v30 }
 0x375   :  { %v446_v33 = vmax.f32 %v443_v31, 0.0 }
 0x377   :  { %v448_v34 = vpack.c.bf16 %v446_v33, %v446_v33 }
 0x379   :  { %v452_v36 = vunpack.c.l.b16 %v448_v34 }
 0x37b   :  { %v453_v37 = vpack.c.b16 %v452_v36, %v451_v35 }
 0x37d   :  { %524 = vmatmul.bf16.gmra.mxu0 %v453_v37 }
 0x388   :  { %v599_v39 = vpop.f32.mrf.mxu1 }
 0x389   :  { %v600_v40 = vadd.f32 %v1177_v38, %v599_v39 }
 0x38b   :  { %614 = vmax.xlane.f32.xlu0 %v600_v40 }
 0x390   :  { %v601_v41 = vpop.f32.mrf.mxu1 }
 0x391   :  { %v602_v42 = vadd.f32 %v1177_v38, %v601_v41 }
 0x393   :  { %616 = vmax.xlane.f32.xlu0 %v602_v42 }
 0x398   :  { %v604_v43 = vpop.f32.mrf.mxu1 }
 0x399   :  { %v605_v44 = vadd.f32 %v1177_v38, %v604_v43 }
 0x39b   :  { %618 = vmax.xlane.f32.xlu1 %v605_v44 }
 0x3a0   :  { %v606_v45 = vpop.f32.mrf.mxu1 }
 0x3a1   :  { %v607_v46 = vadd.f32 %v1177_v38, %v606_v45 }
 0x3a3   :  { %620 = vmax.xlane.f32.xlu1 %v607_v46 }
 0x3fa   :  { %v525_v47 = vpop.f32.mrf.mxu0 }
 0x3fb   :  { %v526_v51 = vadd.f32 %v986_v12, %v525_v47 }
 0x3fd   :  { %v534_v56 = vmax.f32 %v526_v51, 0.0 }
 0x3fe   :  { %v615_v48 = vpop.xlane.xlu0 %614 }
 0x3ff   :  { %v626_v49 = vsub.f32 %v600_v40, %v615_v48 }
 0x401   :  { %v632_v50 = vmul.f32 1.442695, %v626_v49 }
 0x402   :  { %v527_v52 = vpop.f32.mrf.mxu0 }
 0x403   :  { %989 = vpow2.f32 %v632_v50  ;;  %v528_v53 = vadd.f32 %v986_v12, %v527_v52 }
 0x405   :  { %v535_v57 = vmax.f32 %v528_v53, 0.0 }
 0x406   :  { %v617_v54 = vpop.xlane.xlu0 %616 }
 0x407   :  { %v627_v55 = vsub.f32 %v602_v42, %v617_v54  ;;  %v538_v60 = vpack.c.bf16 %v535_v57, %v534_v56 }
 0x409   :  { %v990_v58 = vpop.eup %989  ;;  %v634_v59 = vmul.f32 1.442695, %v627_v55  ;;  %608 = vmatmul.bf16.gmra.mxu1 %v538_v60 }
 0x40a   :  { %644 = vadd.xlane.f32.xlu0 %v990_v58 }
 0x40b   :  { %991 = vpow2.f32 %v634_v59 }
 0x40e   :  { %v619_v61 = vpop.xlane.xlu1 %618 }
 0x40f   :  { %v628_v16 = vsub.f32 %v605_v44, %v619_v61 }
 0x411   :  { %v992_v62 = vpop.eup %991  ;;  %v636_v23 = vmul.f32 1.442695, %v628_v16 }
 0x412   :  { %646 = vadd.xlane.f32.xlu1 %v992_v62 }
 0x416   :  { %v621_v63 = vpop.xlane.xlu1 %620 }
 0x417   :  { %v629_v0 = vsub.f32 %v607_v46, %v621_v63 }
 0x419   :  { %v638_v1 = vmul.f32 1.442695, %v629_v0 }
 0x41b   :  { %993 = vpow2.f32 %v638_v1 }
 0x421   :  { %v1183_v2 = vpop.eup %993 }
 0x422   :  { %650 = vadd.xlane.f32.xlu0 %v1183_v2 }
 0x47d   :  { %v645_v3 = vpop.xlane.xlu0 %644 }
 0x47e   :  { %995 = vrcp.f32 %v645_v3  ;;  %v667_v8 = vand.u32 2147483648, %v645_v3  ;;  %v665_v10 = vand.u32 2147483647, %v645_v3  ;;  %vm661_vm2 = vweird.f32 %v645_v3 }
 0x480   :  { %v668_v15 = vor.u32 1.1754944e-38, %v667_v8  ;;  %vm666_vm4 = vcmp.eq.f32.partialorder %v665_v10, 8.507059e+37 }
 0x484   :  { %v996_v4 = vpop.eup %995 }
 0x485   :  { %v657_v5 = vmul.f32 %v996_v4, %v645_v3  ;;  %v647_v6 = vpop.xlane.xlu1 %646  ;;  %vm662_vm1 = vweird.f32 %v996_v4 }
 0x486   :  { %997 = vrcp.f32 %v647_v6  ;;  %v609_v11 = vpop.f32.mrf.mxu1  ;;  %vm663_vm3 = vmor %vm661_vm2, %vm662_vm1  ;;  %v682_v22 = vand.u32 2147483648, %v647_v6  ;;  %v680_v25 = vand.u32 2147483647, %v647_v6  ;;  %vm676_vm6 = vweird.f32 %v647_v6 }
 0x487   :  { %v658_v7 = vsub.f32 1.0, %v657_v5  ;;  %v610_v12 = vadd.f32 %v1177_v38, %v609_v11  ;;  %999 = vpow2.f32 %v636_v23 }
 0x488   :  { %v683_v29 = vor.u32 1.1754944e-38, %v682_v22  ;;  %vm681_vm8 = vcmp.eq.f32.partialorder %v680_v25, 8.507059e+37 }
 0x489   :  { %v659_v9 = vmul.f32 %v996_v4, %v658_v7  ;;  %622 = vmax.xlane.f32.xlu2 %v610_v12 }
 0x48b   :  { %v660_v13 = vadd.f32 %v996_v4, %v659_v9 }
 0x48c   :  { %v998_v14 = vpop.eup %997 }
 0x48d   :  { %v664_v17 = vsel %vm663_vm3, %v996_v4, %v660_v13  ;;  %v672_v18 = vmul.f32 %v998_v14, %v647_v6  ;;  %vm677_vm5 = vweird.f32 %v998_v14  ;;  %v1000_v34 = vpop.eup %999 }
 0x48e   :  { %v669_v19 = vsel %vm666_vm4, %v668_v15, %v664_v17  ;;  %v611_v26 = vpop.f32.mrf.mxu1  ;;  %vm678_vm7 = vmor %vm676_vm6, %vm677_vm5 }
 0x48f   :  { %v746_v20 = vmul.f32 %v990_v58, %v669_v19  ;;  %v673_v21 = vsub.f32 1.0, %v672_v18  ;;  %v612_v27 = vadd.f32 %v1177_v38, %v611_v26 }
 0x491   :  { %752 = vst [vmem:[%s1215_s8] sm:$0xff] %v746_v20  ;;  %v674_v24 = vmul.f32 %v998_v14, %v673_v21  ;;  %624 = vmax.xlane.f32.xlu2 %v612_v27 }
 0x493   :  { %v675_v28 = vadd.f32 %v998_v14, %v674_v24 }
 0x495   :  { %v679_v30 = vsel %vm678_vm7, %v998_v14, %v675_v28  ;;  %v651_v31 = vpop.xlane.xlu0 %650 }
 0x496   :  { %v684_v32 = vsel %vm681_vm8, %v683_v29, %v679_v30  ;;  %1001 = vrcp.f32 %v651_v31  ;;  %v712_v38 = vand.u32 2147483648, %v651_v31  ;;  %v710_v40 = vand.u32 2147483647, %v651_v31 }
 0x497   :  { %v747_v33 = vmul.f32 %v992_v62, %v684_v32  ;;  %vm706_vm10 = vweird.f32 %v651_v31 }
 0x498   :  { %v713_v42 = vor.u32 1.1754944e-38, %v712_v38  ;;  %vm711_vm12 = vcmp.eq.f32.partialorder %v710_v40, 8.507059e+37 }
 0x499   :  { %753 = vst [vmem:[%s1215_s8 + $0x8] sm:$0xff] %v747_v33  ;;  %648 = vadd.xlane.f32.xlu2 %v1000_v34 }
 0x49c   :  { %v1002_v35 = vpop.eup %1001 }
 0x49d   :  { %v702_v36 = vmul.f32 %v1002_v35, %v651_v31  ;;  %vm707_vm9 = vweird.f32 %v1002_v35 }
 0x49e   :  { %vm708_vm11 = vmor %vm706_vm10, %vm707_vm9 }
 0x49f   :  { %v703_v37 = vsub.f32 1.0, %v702_v36 }
 0x4a1   :  { %v704_v39 = vmul.f32 %v1002_v35, %v703_v37 }
 0x4a3   :  { %v705_v41 = vadd.f32 %v1002_v35, %v704_v39 }
 0x4a5   :  { %v709_v43 = vsel %vm708_vm11, %v1002_v35, %v705_v41 }
 0x4a6   :  { %v714_v44 = vsel %vm711_vm12, %v713_v42, %v709_v43 }
 0x4a7   :  { %v749_v45 = vmul.f32 %v1183_v2, %v714_v44 }
 0x4a9   :  { %755 = vst [vmem:[%s1215_s8 + $0x18] sm:$0xff] %v749_v45 }
 0x4fc   :  { %v623_v46 = vpop.xlane.xlu2 %622 }
 0x4fd   :  { %v630_v47 = vsub.f32 %v610_v12, %v623_v46 }
 0x4ff   :  { %v640_v48 = vmul.f32 1.442695, %v630_v47 }
 0x501   :  { %1003 = vpow2.f32 %v640_v48 }
 0x504   :  { %v625_v49 = vpop.xlane.xlu2 %624 }
 0x505   :  { %v631_v50 = vsub.f32 %v612_v27, %v625_v49 }
 0x507   :  { %v1004_v51 = vpop.eup %1003  ;;  %v642_v52 = vmul.f32 1.442695, %v631_v50 }
 0x508   :  { %652 = vadd.xlane.f32.xlu1 %v1004_v51 }
 0x509   :  { %1005 = vpow2.f32 %v642_v52 }
 0x50c   :  { %v649_v53 = vpop.xlane.xlu2 %648 }
 0x50d   :  { %1007 = vrcp.f32 %v649_v53  ;;  %v697_v58 = vand.u32 2147483648, %v649_v53  ;;  %v695_v60 = vand.u32 2147483647, %v649_v53  ;;  %vm691_vm14 = vweird.f32 %v649_v53 }
 0x50f   :  { %v1006_v54 = vpop.eup %1005  ;;  %v698_v62 = vor.u32 1.1754944e-38, %v697_v58  ;;  %vm696_vm0 = vcmp.eq.f32.partialorder %v695_v60, 8.507059e+37 }
 0x510   :  { %654 = vadd.xlane.f32.xlu2 %v1006_v54 }
 0x513   :  { %v1008_v55 = vpop.eup %1007 }
 0x514   :  { %v687_v56 = vmul.f32 %v1008_v55, %v649_v53  ;;  %vm692_vm13 = vweird.f32 %v1008_v55 }
 0x515   :  { %vm693_vm15 = vmor %vm691_vm14, %vm692_vm13 }
 0x516   :  { %v688_v57 = vsub.f32 1.0, %v687_v56 }
 0x518   :  { %v689_v59 = vmul.f32 %v1008_v55, %v688_v57 }
 0x51a   :  { %v690_v61 = vadd.f32 %v1008_v55, %v689_v59 }
 0x51c   :  { %v694_v63 = vsel %vm693_vm15, %v1008_v55, %v690_v61 }
 0x51d   :  { %v699_v0 = vsel %vm696_vm0, %v698_v62, %v694_v63 }
 0x51e   :  { %v748_v1 = vmul.f32 %v1000_v34, %v699_v0 }
 0x520   :  { %754 = vst [vmem:[%s1215_s8 + $0x10] sm:$0xff] %v748_v1 }
 0x57b   :  { %v653_v2 = vpop.xlane.xlu1 %652 }
 0x57c   :  { %1009 = vrcp.f32 %v653_v2  ;;  %v727_v7 = vand.u32 2147483648, %v653_v2  ;;  %v725_v9 = vand.u32 2147483647, %v653_v2  ;;  %vm721_vm2 = vweird.f32 %v653_v2 }
 0x57e   :  { %v728_v12 = vor.u32 1.1754944e-38, %v727_v7  ;;  %vm726_vm4 = vcmp.eq.f32.partialorder %v725_v9, 8.507059e+37 }
 0x582   :  { %v1010_v3 = vpop.eup %1009 }
 0x583   :  { %v717_v4 = vmul.f32 %v1010_v3, %v653_v2  ;;  %v655_v5 = vpop.xlane.xlu2 %654  ;;  %vm722_vm1 = vweird.f32 %v1010_v3 }
 0x584   :  { %1011 = vrcp.f32 %v655_v5  ;;  %vm723_vm3 = vmor %vm721_vm2, %vm722_vm1  ;;  %v742_v18 = vand.u32 2147483648, %v655_v5  ;;  %v740_v20 = vand.u32 2147483647, %v655_v5  ;;  %vm736_vm6 = vweird.f32 %v655_v5 }
 0x585   :  { %v718_v6 = vsub.f32 1.0, %v717_v4 }
 0x586   :  { %v743_v22 = vor.u32 1.1754944e-38, %v742_v18  ;;  %vm741_vm8 = vcmp.eq.f32.partialorder %v740_v20, 8.507059e+37 }
 0x587   :  { %v719_v8 = vmul.f32 %v1010_v3, %v718_v6 }
 0x589   :  { %v720_v10 = vadd.f32 %v1010_v3, %v719_v8 }
 0x58a   :  { %v1012_v11 = vpop.eup %1011 }
 0x58b   :  { %v724_v13 = vsel %vm723_vm3, %v1010_v3, %v720_v10  ;;  %v732_v14 = vmul.f32 %v1012_v11, %v655_v5  ;;  %vm737_vm5 = vweird.f32 %v1012_v11 }
 0x58c   :  { %v729_v15 = vsel %vm726_vm4, %v728_v12, %v724_v13  ;;  %vm738_vm7 = vmor %vm736_vm6, %vm737_vm5 }
 0x58d   :  { %v750_v16 = vmul.f32 %v1004_v51, %v729_v15  ;;  %v733_v17 = vsub.f32 1.0, %v732_v14 }
 0x58f   :  { %756 = vst [vmem:[%s1215_s8 + $0x20] sm:$0xff] %v750_v16  ;;  %v734_v19 = vmul.f32 %v1012_v11, %v733_v17 }
 0x591   :  { %v735_v21 = vadd.f32 %v1012_v11, %v734_v19 }
 0x593   :  { %v739_v23 = vsel %vm738_vm7, %v1012_v11, %v735_v21 }
 0x594   :  { %v744_v24 = vsel %vm741_vm8, %v743_v22, %v739_v23 }
 0x595   :  { %v751_v25 = vmul.f32 %v1006_v54, %v744_v24 }
 0x597   :  { %757 = vst [vmem:[%s1215_s8 + $0x28] sm:$0xff] %v751_v25 }
 0x598   :  { %762 = vsyncpa [#allocation3], 1 }
 0x599   :  { %763 = vsyncpa [#allocation5], 1 }

</bundles_post_ra>
